<compile_context>
chip_gen: v7x
topology: tpu7x:2x2x1
jax: 0.10.0
libtpu: 0.0.40
codegen_flags: <defaults>
</compile_context>

<pallas_src>
import functools

import jax
import jax.numpy as jnp
from jax.experimental import pallas as pl
from jax.experimental.pallas import tpu as pltpu

LANE = 128
SUBLANE = 8


def _round_up(n, m):
    return ((n + m - 1) // m) * m


def residual_block_kernel(x_ref, wcat_ref, bcat_ref, w2_ref, b2_ref,
                          gamma_ref, beta_ref, o_ref, *, hid_p, out_dim):
    # x tile: [TILE_B, in_p] in compute dtype (bf16 by default).
    x = x_ref[...]

    # Fused matmul: x @ [W1 | Wr]  -> [TILE_B, hid_p + out_p], f32 accumulation.
    hr = jnp.dot(x, wcat_ref[...], preferred_element_type=jnp.float32) + bcat_ref[...]

    # Slice (lane-aligned: hid_p is a multiple of 128).
    h = jnp.maximum(hr[:, :hid_p], 0.0)          # Linear1 + ReLU
    res = hr[:, hid_p:]                          # residual projection (+ br)

    # Linear 2 (MXU), f32 accumulation.
    out = jnp.dot(h.astype(w2_ref.dtype), w2_ref[...],
                  preferred_element_type=jnp.float32) + b2_ref[...]

    # Dropout -> identity (eval mode).  Residual add.
    out = out + res

    # LayerNorm over the TRUE feature dim.  Pad lanes of `out` are exactly zero
    # (zero-padded weights/biases), so summing all lanes and dividing by out_dim
    # is exact.  Single reduction pass: mean and E[x^2].
    inv_n = 1.0 / float(out_dim)
    s = jnp.sum(out, axis=-1, keepdims=True)
    ss = jnp.sum(out * out, axis=-1, keepdims=True)
    mean = s * inv_n
    var = ss * inv_n - mean * mean
    out = (out - mean) * jax.lax.rsqrt(var + 1e-5)
    out = out * gamma_ref[...] + beta_ref[...]

    o_ref[...] = out.astype(o_ref.dtype)


def _vmem_estimate(tile_b, in_p, hid_p, out_p, cdt_size, out_size):
    x_tiles = 2 * tile_b * in_p * cdt_size           # double-buffered input tile
    o_tiles = 2 * tile_b * out_p * out_size          # double-buffered output tile
    weights = (in_p * (hid_p + out_p) + hid_p * out_p) * cdt_size
    smalls = (hid_p + out_p + 4 * out_p) * 4         # biases + LN params (f32)
    temps = tile_b * (hid_p + out_p) * 4 + 2 * tile_b * out_p * 4
    return x_tiles + o_tiles + weights + smalls + temps


def residual_block(x, params, *, tile_b=256, compute_dtype=jnp.bfloat16):
    """x: [B, input_dim] float32. params: dict of PyTorch-convention weights."""
    B, input_dim = x.shape
    hidden_dim = params["w1"].shape[0]
    output_dim = params["w2"].shape[0]

    in_p = _round_up(input_dim, LANE)
    hid_p = _round_up(hidden_dim, LANE)
    out_p = _round_up(output_dim, LANE)

    # Batch tiling: TILE_B rows per grid step (multiple of 8 sublanes).
    tile_b = max(SUBLANE, min(_round_up(tile_b, SUBLANE), _round_up(B, SUBLANE)))
    B_p = _round_up(B, tile_b)
    n_steps = B_p // tile_b

    # --- Wrapper-side padding / layout prep (zero-pad so math is unchanged) ---
    cdt = compute_dtype
    x_p = jnp.pad(x, ((0, B_p - B), (0, in_p - input_dim))).astype(cdt)

    w1_t = jnp.pad(params["w1"].T, ((0, in_p - input_dim), (0, hid_p - hidden_dim)))
    wr_t = jnp.pad(params["wr"].T, ((0, in_p - input_dim), (0, out_p - output_dim)))
    w_cat = jnp.concatenate([w1_t, wr_t], axis=1).astype(cdt)   # [in_p, hid_p+out_p]

    b1 = jnp.pad(params["b1"], (0, hid_p - hidden_dim))
    br = jnp.pad(params["br"], (0, out_p - output_dim))
    b_cat = jnp.concatenate([b1, br]).reshape(1, hid_p + out_p).astype(jnp.float32)

    w2_t = jnp.pad(params["w2"].T,
                   ((0, hid_p - hidden_dim), (0, out_p - output_dim))).astype(cdt)
    b2 = jnp.pad(params["b2"], (0, out_p - output_dim)).reshape(1, out_p)
    gamma = jnp.pad(params["ln_gamma"], (0, out_p - output_dim)).reshape(1, out_p)
    beta = jnp.pad(params["ln_beta"], (0, out_p - output_dim)).reshape(1, out_p)
    b2 = b2.astype(jnp.float32)
    gamma = gamma.astype(jnp.float32)
    beta = beta.astype(jnp.float32)

    cdt_size = jnp.dtype(cdt).itemsize
    out_size = jnp.dtype(x.dtype).itemsize
    vmem_limit = int(1.25 * _vmem_estimate(tile_b, in_p, hid_p, out_p,
                                           cdt_size, out_size)) + (2 << 20)
    vmem_limit = max(16 << 20, min(vmem_limit, 64 << 20))

    tiled = lambda shape: pl.BlockSpec(shape, lambda i: (i, 0))
    resident = lambda shape: pl.BlockSpec(shape, lambda i: (0, 0))

    kernel = functools.partial(residual_block_kernel,
                               hid_p=hid_p, out_dim=output_dim)

    out_p_full = pl.pallas_call(
        kernel,
        out_shape=jax.ShapeDtypeStruct((B_p, out_p), x.dtype),
        grid=(n_steps,),
        in_specs=[
            tiled((tile_b, in_p)),                 # x tile (double-buffered)
            resident((in_p, hid_p + out_p)),       # fused [W1 | Wr]
            resident((1, hid_p + out_p)),          # fused [b1 | br]
            resident((hid_p, out_p)),              # W2
            resident((1, out_p)),                  # b2
            resident((1, out_p)),                  # LN gamma
            resident((1, out_p)),                  # LN beta
        ],
        out_specs=tiled((tile_b, out_p)),
        compiler_params=pltpu.CompilerParams(
            dimension_semantics=("parallel",),
            vmem_limit_bytes=vmem_limit,
        ),
    )(x_p, w_cat, b_cat, w2_t, b2, gamma, beta)

    return out_p_full[:B, :output_dim]


def make_params(key, input_dim, hidden_dim, output_dim):
    """Deterministic synthetic parameters, PyTorch shape conventions."""
    ks = jax.random.split(key, 6)
    scale = 0.1
    return {
        "w1": scale * jax.random.normal(ks[0], (hidden_dim, input_dim), jnp.float32),
        "b1": scale * jax.random.normal(ks[1], (hidden_dim,), jnp.float32),
        "w2": scale * jax.random.normal(ks[2], (output_dim, hidden_dim), jnp.float32),
        "b2": scale * jax.random.normal(ks[3], (output_dim,), jnp.float32),
        "wr": scale * jax.random.normal(ks[4], (output_dim, input_dim), jnp.float32),
        "br": scale * jax.random.normal(ks[5], (output_dim,), jnp.float32),
        "ln_gamma": jnp.ones((output_dim,), jnp.float32),
        "ln_beta": jnp.zeros((output_dim,), jnp.float32),
    }


def reference(x, p, compute_dtype=jnp.bfloat16):
    """Pure-JAX reference matching PyTorch eval-mode forward (same matmul dtype)."""
    cd = compute_dtype
    xc = x.astype(cd)
    res = jnp.dot(xc, p["wr"].T.astype(cd),
                  preferred_element_type=jnp.float32) + p["br"]
    out = jnp.dot(xc, p["w1"].T.astype(cd),
                  preferred_element_type=jnp.float32) + p["b1"]
    out = jnp.maximum(out, 0.0)
    out = jnp.dot(out.astype(cd), p["w2"].T.astype(cd),
                  preferred_element_type=jnp.float32) + p["b2"]
    out = out + res
    mean = out.mean(-1, keepdims=True)
    var = ((out - mean) ** 2).mean(-1, keepdims=True)
    out = (out - mean) * jax.lax.rsqrt(var + 1e-5)
    return out * p["ln_gamma"] + p["ln_beta"]


if __name__ == "__main__":
    key = jax.random.PRNGKey(0)

    # --- Small test (original module-consistent shapes) ---
    k_x, k_p = jax.random.split(key)
    B, input_dim, hidden_dim, output_dim = 8, 16, 32, 24
    x = jax.random.normal(k_x, (B, input_dim), jnp.float32)
    params = make_params(k_p, input_dim, hidden_dim, output_dim)

    out = residual_block(x, params)
    out = jax.block_until_ready(out)
    ref = reference(x, params)
    assert out.shape == (B, output_dim)
    assert jnp.allclose(out, ref, atol=5e-3, rtol=5e-3), "small-case mismatch"

    # --- Larger test: exercises multi-step batch grid + padding paths ---
    k_x2, k_p2 = jax.random.split(jax.random.PRNGKey(1))
    B2, in2, hid2, out2 = 272, 160, 320, 200
    x2 = jax.random.normal(k_x2, (B2, in2), jnp.float32)
    params2 = make_params(k_p2, in2, hid2, out2)

    o2 = residual_block(x2, params2, tile_b=128)
    o2 = jax.block_until_ready(o2)
    r2 = reference(x2, params2)
    assert o2.shape == (B2, out2)
    assert jnp.allclose(o2, r2, atol=1e-2, rtol=1e-2), "large-case mismatch"

    print("KERNEL_OK")
</pallas_src>

<mosaic_0001>
module attributes {stable_mosaic.version = 11 : i64} {
  func.func @residual_block_kernel(%arg0: i32, %arg1: memref<8x128xbf16, #tpu.memory_space<vmem>>, %arg2: memref<128x256xbf16, #tpu.memory_space<vmem>>, %arg3: memref<1x256xf32, #tpu.memory_space<vmem>>, %arg4: memref<128x128xbf16, #tpu.memory_space<vmem>>, %arg5: memref<1x128xf32, #tpu.memory_space<vmem>>, %arg6: memref<1x128xf32, #tpu.memory_space<vmem>>, %arg7: memref<1x128xf32, #tpu.memory_space<vmem>>, %arg8: memref<8x128xf32, #tpu.memory_space<vmem>>) attributes {dimension_semantics = [#tpu.dimension_semantics<parallel>], iteration_bounds = array<i64: 1>, scalar_prefetch = 0 : i64, scratch_operands = 0 : i64, tpu.core_type = #tpu.core_type<tc>, window_params = [{transform_indices = @transform_0, window_bounds = array<i64: 8, 128>}, {pipeline_mode = #tpu.pipeline_mode<synchronous>, transform_indices = @transform_1, window_bounds = array<i64: 128, 256>}, {pipeline_mode = #tpu.pipeline_mode<synchronous>, transform_indices = @transform_2, window_bounds = array<i64: 1, 256>}, {pipeline_mode = #tpu.pipeline_mode<synchronous>, transform_indices = @transform_3, window_bounds = array<i64: 128, 128>}, {pipeline_mode = #tpu.pipeline_mode<synchronous>, transform_indices = @transform_4, window_bounds = array<i64: 1, 128>}, {pipeline_mode = #tpu.pipeline_mode<synchronous>, transform_indices = @transform_5, window_bounds = array<i64: 1, 128>}, {pipeline_mode = #tpu.pipeline_mode<synchronous>, transform_indices = @transform_6, window_bounds = array<i64: 1, 128>}, {transform_indices = @transform_7, window_bounds = array<i64: 8, 128>}]} {
    %c0 = arith.constant 0 : index
    %c0_0 = arith.constant 0 : index
    %0 = vector.load %arg1[%c0, %c0_0] : memref<8x128xbf16, #tpu.memory_space<vmem>>, vector<8x128xbf16>
    %c0_1 = arith.constant 0 : index
    %c0_2 = arith.constant 0 : index
    %1 = vector.load %arg2[%c0_1, %c0_2] : memref<128x256xbf16, #tpu.memory_space<vmem>>, vector<128x256xbf16>
    %cst = arith.constant dense<0.000000e+00> : vector<8x256xf32>
    %2 = tpu.matmul %0, %1, %cst {dimension_numbers = #tpu.dot_dimension_numbers<[1], [0], [0], [1], [0, 0, 1, 1], [], []>} : vector<8x128xbf16>, vector<128x256xbf16>, vector<8x256xf32> -> vector<8x256xf32>
    %c0_3 = arith.constant 0 : index
    %c0_4 = arith.constant 0 : index
    %3 = vector.load %arg3[%c0_3, %c0_4] : memref<1x256xf32, #tpu.memory_space<vmem>>, vector<1x256xf32>
    %4 = vector.broadcast %3 : vector<1x256xf32> to vector<8x256xf32>
    %5 = arith.addf %2, %4 : vector<8x256xf32>
    %6 = vector.extract_strided_slice %5 {offsets = [0, 0], sizes = [8, 128], strides = [1, 1]} : vector<8x256xf32> to vector<8x128xf32>
    %cst_5 = arith.constant 0.000000e+00 : f32
    %7 = vector.broadcast %cst_5 : f32 to vector<8x128xf32>
    %8 = arith.maximumf %6, %7 : vector<8x128xf32>
    %9 = vector.extract_strided_slice %5 {offsets = [0, 128], sizes = [8, 128], strides = [1, 1]} : vector<8x256xf32> to vector<8x128xf32>
    %10 = arith.truncf %8 : vector<8x128xf32> to vector<8x128xbf16>
    %c0_6 = arith.constant 0 : index
    %c0_7 = arith.constant 0 : index
    %11 = vector.load %arg4[%c0_6, %c0_7] : memref<128x128xbf16, #tpu.memory_space<vmem>>, vector<128x128xbf16>
    %cst_8 = arith.constant dense<0.000000e+00> : vector<8x128xf32>
    %12 = tpu.matmul %10, %11, %cst_8 {dimension_numbers = #tpu.dot_dimension_numbers<[1], [0], [0], [1], [0, 0, 1, 1], [], []>} : vector<8x128xbf16>, vector<128x128xbf16>, vector<8x128xf32> -> vector<8x128xf32>
    %c0_9 = arith.constant 0 : index
    %c0_10 = arith.constant 0 : index
    %13 = vector.load %arg5[%c0_9, %c0_10] : memref<1x128xf32, #tpu.memory_space<vmem>>, vector<1x128xf32>
    %14 = vector.broadcast %13 : vector<1x128xf32> to vector<8x128xf32>
    %15 = arith.addf %12, %14 : vector<8x128xf32>
    %16 = arith.addf %15, %9 : vector<8x128xf32>
    %cst_11 = arith.constant dense<0.000000e+00> : vector<8xf32>
    %17 = vector.multi_reduction <add>, %16, %cst_11 [1] : vector<8x128xf32> to vector<8xf32>
    %18 = vector.shape_cast %17 : vector<8xf32> to vector<8x1xf32>
    %19 = arith.mulf %16, %16 : vector<8x128xf32>
    %cst_12 = arith.constant dense<0.000000e+00> : vector<8xf32>
    %20 = vector.multi_reduction <add>, %19, %cst_12 [1] : vector<8x128xf32> to vector<8xf32>
    %21 = vector.shape_cast %20 : vector<8xf32> to vector<8x1xf32>
    %cst_13 = arith.constant 0.0416666679 : f32
    %22 = vector.broadcast %cst_13 : f32 to vector<8x1xf32>
    %23 = arith.mulf %18, %22 : vector<8x1xf32>
    %cst_14 = arith.constant 0.0416666679 : f32
    %24 = vector.broadcast %cst_14 : f32 to vector<8x1xf32>
    %25 = arith.mulf %21, %24 : vector<8x1xf32>
    %26 = arith.mulf %23, %23 : vector<8x1xf32>
    %27 = arith.subf %25, %26 : vector<8x1xf32>
    %28 = vector.broadcast %23 : vector<8x1xf32> to vector<8x128xf32>
    %29 = arith.subf %16, %28 : vector<8x128xf32>
    %cst_15 = arith.constant 9.99999974E-6 : f32
    %30 = vector.broadcast %cst_15 : f32 to vector<8x1xf32>
    %31 = arith.addf %27, %30 : vector<8x1xf32>
    %32 = math.rsqrt %31 : vector<8x1xf32>
    %33 = vector.broadcast %32 : vector<8x1xf32> to vector<8x128xf32>
    %34 = arith.mulf %29, %33 : vector<8x128xf32>
    %c0_16 = arith.constant 0 : index
    %c0_17 = arith.constant 0 : index
    %35 = vector.load %arg6[%c0_16, %c0_17] : memref<1x128xf32, #tpu.memory_space<vmem>>, vector<1x128xf32>
    %36 = vector.broadcast %35 : vector<1x128xf32> to vector<8x128xf32>
    %37 = arith.mulf %34, %36 : vector<8x128xf32>
    %c0_18 = arith.constant 0 : index
    %c0_19 = arith.constant 0 : index
    %38 = vector.load %arg7[%c0_18, %c0_19] : memref<1x128xf32, #tpu.memory_space<vmem>>, vector<1x128xf32>
    %39 = vector.broadcast %38 : vector<1x128xf32> to vector<8x128xf32>
    %40 = arith.addf %37, %39 : vector<8x128xf32>
    %c0_20 = arith.constant 0 : index
    %c0_21 = arith.constant 0 : index
    %41 = vector.load %arg8[%c0_20, %c0_21] : memref<8x128xf32, #tpu.memory_space<vmem>>, vector<8x128xf32>
    tpu.vector_store %arg8[%c0_20, %c0_21], %40 {strides = array<i32>} : memref<8x128xf32, #tpu.memory_space<vmem>>, vector<8x128xf32>,
    return
  }
  func.func @transform_0(%arg0: i32) -> (i32, i32) {
    %c0_i32 = arith.constant 0 : i32
    %c0_i32_0 = arith.constant 0 : i32
    return %arg0, %c0_i32 : i32, i32
  }
  func.func @transform_1(%arg0: i32) -> (i32, i32) {
    %c0_i32 = arith.constant 0 : i32
    %c0_i32_0 = arith.constant 0 : i32
    %c0_i32_1 = arith.constant 0 : i32
    return %c0_i32, %c0_i32_0 : i32, i32
  }
  func.func @transform_2(%arg0: i32) -> (i32, i32) {
    %c0_i32 = arith.constant 0 : i32
    %c0_i32_0 = arith.constant 0 : i32
    %c0_i32_1 = arith.constant 0 : i32
    return %c0_i32, %c0_i32_0 : i32, i32
  }
  func.func @transform_3(%arg0: i32) -> (i32, i32) {
    %c0_i32 = arith.constant 0 : i32
    %c0_i32_0 = arith.constant 0 : i32
    %c0_i32_1 = arith.constant 0 : i32
    return %c0_i32, %c0_i32_0 : i32, i32
  }
  func.func @transform_4(%arg0: i32) -> (i32, i32) {
    %c0_i32 = arith.constant 0 : i32
    %c0_i32_0 = arith.constant 0 : i32
    %c0_i32_1 = arith.constant 0 : i32
    return %c0_i32, %c0_i32_0 : i32, i32
  }
  func.func @transform_5(%arg0: i32) -> (i32, i32) {
    %c0_i32 = arith.constant 0 : i32
    %c0_i32_0 = arith.constant 0 : i32
    %c0_i32_1 = arith.constant 0 : i32
    return %c0_i32, %c0_i32_0 : i32, i32
  }
  func.func @transform_6(%arg0: i32) -> (i32, i32) {
    %c0_i32 = arith.constant 0 : i32
    %c0_i32_0 = arith.constant 0 : i32
    %c0_i32_1 = arith.constant 0 : i32
    return %c0_i32, %c0_i32_0 : i32, i32
  }
  func.func @transform_7(%arg0: i32) -> (i32, i32) {
    %c0_i32 = arith.constant 0 : i32
    %c0_i32_0 = arith.constant 0 : i32
    return %arg0, %c0_i32 : i32, i32
  }
}

</mosaic_0001>

<bundles_post_ra>
// kernel: tpu_custom_call.1
= control target key start
LH: loop header
LB: loop body
LE: loop exit
PB: predicated region body
PF: predicated region fallthrough
CT: control target
= control target key end

     0   :  { %12 = vsyncpa [#allocation3], 0  ;;  %s683_s0 = inlined_call_operand.hbm [shape: bf16[8,128], index: 0, kind: input, shape index: {}]   ;;  %s684_s1 = inlined_call_operand.hbm [shape: bf16[128,256], index: 1, kind: input, shape index: {}]   ;;  %s685_s2 = inlined_call_operand.vmem [shape: f32[1,256], index: 2, kind: input, shape index: {}]   ;;  %s686_s3 = inlined_call_operand.hbm [shape: bf16[128,128], index: 3, kind: input, shape index: {}]   ;;  %s687_s4 = inlined_call_operand.vmem [shape: f32[1,128], index: 4, kind: input, shape index: {}]   ;;  %s688_s5 = inlined_call_operand.vmem [shape: f32[1,128], index: 5, kind: input, shape index: {}]   ;;  %s689_s6 = inlined_call_operand.vmem [shape: f32[1,128], index: 6, kind: input, shape index: {}]   ;;  %s690_s7 = inlined_call_operand.hbm [shape: f32[8,128], index: 7, kind: output, shape index: {}]  }
   0x1   :  { %13 = vsyncpa [#allocation6], 0 }
   0x2   :  { %14 = vsyncpa [#allocation4], 0  ;;  %s572_s24 = smov [#allocation5]   ;;  %s478_s28 = scalar_lea.hbm %s684_s1, 2048 }
   0x3   :  { %s30_s25 = sshll.u32 %s572_s24, 4  ;;  %p479_p0 = scmp.ne.s32.totalorder %s684_s1, %s478_s28  ;;  %s31_s25 = int_to_ptr.vmem [resolvable:$true] %s30_s25 }
   0x4   :  { %p482_p1 = scmp.lt.u32.totalorder %s478_s28, %s684_s1 }
   0x6   :  { %p484_p2 = pnand %p482_p1, %p479_p0 }
   0x8   :  { %487 = shalt.err (!%p484_p2)
}
   0x9   :  { %s488_s10 = scalar_lea.vmem %s31_s25, 2048  ;;  %p493_p4 = scmp.lt.s32.totalorder %s31_s25, %s31_s25 }
   0xa   :  { %p489_p3 = scmp.ne.s32.totalorder %s31_s25, %s488_s10  ;;  %p494_p5 = scmp.lt.s32.totalorder %s488_s10, %s488_s10 }
   0xc   :  { %p495_p6 = por %p494_p5, %p493_p4 }
   0xe   :  { %p496_p7 = pnand %p495_p6, %p489_p3 }
  0x10   :  { %499 = shalt.err (!%p496_p7)
}
  0x11   :  { %s573_s11 = smov 128   ;;  %s574_s12 = smov 8  }
  0x12   :  { %36 = dma.hbm_to_vmem [thread:$0]  %s684_s1, 2048, %s31_s25, [#allocation6], %s573_s11, %s573_s11, %s574_s12  }
  0x13   :  { %s575_s15 = smov [#allocation2]   ;;  %s576_s17 = smov [#allocation7]  }
  0x14   :  { %s21_s16 = sshll.u32 %s575_s15, 4  ;;  %s44_s18 = sshll.u32 %s576_s17, 4  ;;  %s22_s16 = int_to_ptr.vmem [resolvable:$true] %s21_s16  ;;  %s45_s18 = int_to_ptr.vmem [resolvable:$true] %s44_s18 }
  0x15   :  { %s500_s21 = scalar_lea.hbm %s683_s0, 64 }
  0x16   :  { %p501_p8 = scmp.ne.s32.totalorder %s683_s0, %s500_s21  ;;  %p504_p9 = scmp.lt.u32.totalorder %s500_s21, %s683_s0 }
  0x18   :  { %p506_p10 = pnand %p504_p9, %p501_p8 }
  0x1a   :  { %509 = shalt.err (!%p506_p10)
}
  0x1b   :  { %s510_s1 = scalar_lea.vmem %s22_s16, 64  ;;  %p515_p12 = scmp.lt.s32.totalorder %s22_s16, %s22_s16 }
  0x1c   :  { %p511_p11 = scmp.ne.s32.totalorder %s22_s16, %s510_s1  ;;  %p516_p13 = scmp.lt.s32.totalorder %s510_s1, %s510_s1 }
  0x1e   :  { %p517_p0 = por %p516_p13, %p515_p12 }
  0x20   :  { %p518_p1 = pnand %p517_p0, %p511_p11 }
  0x22   :  { %521 = shalt.err (!%p518_p1)
}
  0x23   :  { %24 = dma.hbm_to_vmem [thread:$0]  %s683_s0, 64, %s22_s16, [#allocation3]  }
  0x24   :  { %s522_s30 = scalar_lea.hbm %s686_s3, 1024 }
  0x25   :  { %p523_p2 = scmp.ne.s32.totalorder %s686_s3, %s522_s30  ;;  %p526_p3 = scmp.lt.u32.totalorder %s522_s30, %s686_s3 }
  0x27   :  { %p528_p4 = pnand %p526_p3, %p523_p2 }
  0x29   :  { %531 = shalt.err (!%p528_p4)
}
  0x2a   :  { %s532_s12 = scalar_lea.vmem %s45_s18, 1024  ;;  %p537_p6 = scmp.lt.s32.totalorder %s45_s18, %s45_s18 }
  0x2b   :  { %p533_p5 = scmp.ne.s32.totalorder %s45_s18, %s532_s12  ;;  %p538_p7 = scmp.lt.s32.totalorder %s532_s12, %s532_s12 }
  0x2d   :  { %p539_p8 = por %p538_p7, %p537_p6 }
  0x2f   :  { %p540_p9 = pnand %p539_p8, %p533_p5 }
  0x31   :  { %543 = shalt.err (!%p540_p9)
}
  0x32   :  { %s577_s0 = smov 64   ;;  %s578_s13 = smov 4  }
  0x33   :  { %50 = dma.hbm_to_vmem [thread:$0]  %s686_s3, 1024, %s45_s18, [#allocation6], %s577_s0, %s577_s0, %s578_s13  }
  0x34   :  { %566 = dma.done.wait [#allocation3], 64  }
  0x35   :  { %567 = vsyncadd [#allocation3], 4294967232 }
  0x36   :  { %568 = dma.done.wait [#allocation6], 3072  }
  0x37   :  { %569 = vsyncadd [#allocation6], 4294964224  ;;  %v579_v0 = vmov 0   ;;  %v580_v1 = vmov 0.0   ;;  %v444_v2 = vld [vmem:[#allocation5 + $0x4] ss:$8 sps:$4 sm:$0xff]   ;;  %v86_v27 = vlaneseq }
  0x38   :  { %208 = vmatprep.mubr.bf16.mxu0 %v579_v0  ;;  %413 = vmatprep.subr.bf16.mxu1 %v580_v1  ;;  %v446_v3 = vld [vmem:[#allocation5] ss:$8 sps:$4 sm:$0xff]   ;;  %v447_v4 = vld [vmem:[#allocation5 + $0x14] ss:$8 sps:$4 sm:$0xff]   ;;  %v449_v5 = vld [vmem:[#allocation5 + $0x10] ss:$8 sps:$4 sm:$0xff]  }
  0x39   :  { %176 = vmatprep.subr.bf16.mxu0 %v444_v2  ;;  %v450_v6 = vld [vmem:[#allocation5 + $0x24] ss:$8 sps:$4 sm:$0xff]   ;;  %v452_v7 = vld [vmem:[#allocation5 + $0x20] ss:$8 sps:$4 sm:$0xff]   ;;  %v453_v8 = vld [vmem:[#allocation5 + $0x34] ss:$8 sps:$4 sm:$0xff]  }
  0x3a   :  { %177 = vmatpush1.bf16.msra.mxu0 %v446_v3  ;;  %v455_v9 = vld [vmem:[#allocation5 + $0x30] ss:$8 sps:$4 sm:$0xff]   ;;  %v468_v10 = vld [vmem:[#allocation7] sm:$0xff]   ;;  %v469_v12 = vld [vmem:[#allocation7 + $0x8] sm:$0xff]   ;;  %vm581_vm0 = vmmov 0   ;;  %v87_v28 = vshrl.u32 %v86_v27, 7 }
  0x3b   :  { %178 = vmatprep.subr.bf16.mxu0 %v447_v4  ;;  %v456_v11 = vld [vmem:[#allocation5 + $0x44] ss:$8 sps:$4 sm:$0xff]   ;;  %414 = vmatpush3.bf16.msra.mxu1 %v468_v10  ;;  %v458_v13 = vld [vmem:[#allocation5 + $0x40] ss:$8 sps:$4 sm:$0xff]   ;;  %v459_v14 = vld [vmem:[#allocation5 + $0x54] ss:$8 sps:$4 sm:$0xff]  }
  0x3c   :  { %415 = vmatprep.subr.bf16.mxu1 %v580_v1  ;;  %v470_v15 = vld [vmem:[#allocation7 + $0x10] sm:$0xff]   ;;  %v462_v17 = vld [vmem:[#allocation5 + $0x64] ss:$8 sps:$4 sm:$0xff]   ;;  %v471_v18 = vld [vmem:[#allocation7 + $0x18] sm:$0xff]   ;;  %429 = vmatprep.mubr.msk.bf16.mxu1 %vm581_vm0, %v580_v1  ;;  %v88_v29 = vsub.s32 0, %v87_v28  ;;  %v92_v39 = vsub.s32 1, %v87_v28 }
  0x3d   :  { %v461_v16 = vld [vmem:[#allocation5 + $0x50] ss:$8 sps:$4 sm:$0xff]   ;;  %v464_v19 = vld [vmem:[#allocation5 + $0x60] ss:$8 sps:$4 sm:$0xff]   ;;  %v465_v20 = vld [vmem:[#allocation5 + $0x74] ss:$8 sps:$4 sm:$0xff]  }
  0x3e   :  { %179 = vmatpush1.bf16.msra.mxu0 %v449_v5  ;;  %v472_v21 = vld [vmem:[#allocation7 + $0x20] sm:$0xff]   ;;  %v467_v22 = vld [vmem:[#allocation5 + $0x70] ss:$8 sps:$4 sm:$0xff]   ;;  %v473_v23 = vld [vmem:[#allocation7 + $0x28] sm:$0xff]   ;;  %s582_s21 = smov [#allocation8]  }
  0x3f   :  { %180 = vmatprep.subr.bf16.mxu0 %v450_v6  ;;  %416 = vmatpush3.bf16.msra.mxu1 %v469_v12  ;;  %v67_v24 = vld [vmem:[#allocation2] sm:$0xf]  ;;  %v474_v25 = vld [vmem:[#allocation7 + $0x30] sm:$0xff]   ;;  %s367_s22 = sshll.u32 %s582_s21, 4  ;;  %s368_s22 = int_to_ptr.vmem [resolvable:$true] %s367_s22 }
  0x40   :  { %417 = vmatprep.subr.bf16.mxu1 %v580_v1  ;;  %v475_v26 = vld [vmem:[#allocation7 + $0x38] sm:$0xff]   ;;  %s544_s23 = scalar_lea.vmem %s368_s22, 128  ;;  %p549_p11 = scmp.lt.s32.totalorder %s368_s22, %s368_s22 }
  0x41   :  { %v84_v30 = vld [vmem:[%s685_s2] sm:$0x3]  ;;  %p545_p10 = scmp.ne.s32.totalorder %s368_s22, %s544_s23  ;;  %p550_p12 = scmp.lt.s32.totalorder %s544_s23, %s544_s23 }
  0x42   :  { %181 = vmatpush1.bf16.msra.mxu0 %v452_v7  ;;  %v89_v31 = vrot.slane %v84_v30, %v88_v29  ;;  %v93_v40 = vrot.slane %v84_v30, %v92_v39  ;;  %v393_v41 = vld [vmem:[%s687_s4] ss:$0 sm:$0xff] }
  0x43   :  { %182 = vmatprep.subr.bf16.mxu0 %v453_v8  ;;  %418 = vmatpush3.bf16.msra.mxu1 %v470_v15  ;;  %v402_v59 = vld [vmem:[%s688_s5] ss:$0 sm:$0xff]  ;;  %p551_p13 = por %p550_p12, %p549_p11 }
  0x44   :  { %419 = vmatprep.subr.bf16.mxu1 %v580_v1  ;;  %v403_v61 = vld [vmem:[%s689_s6] ss:$0 sm:$0xff] }
  0x45   :  { %p552_p0 = pnand %p551_p13, %p545_p10 }
  0x46   :  { %183 = vmatpush1.bf16.msra.mxu0 %v455_v9 }
  0x47   :  { %184 = vmatprep.subr.bf16.mxu0 %v456_v11  ;;  %420 = vmatpush3.bf16.msra.mxu1 %v471_v18 }
  0x48   :  { %421 = vmatprep.subr.bf16.mxu1 %v580_v1 }
  0x4a   :  { %185 = vmatpush1.bf16.msra.mxu0 %v458_v13 }
  0x4b   :  { %186 = vmatprep.subr.bf16.mxu0 %v459_v14  ;;  %422 = vmatpush3.bf16.msra.mxu1 %v472_v21 }
  0x4c   :  { %423 = vmatprep.subr.bf16.mxu1 %v580_v1 }
  0x4e   :  { %187 = vmatpush1.bf16.msra.mxu0 %v461_v16 }
  0x4f   :  { %188 = vmatprep.subr.bf16.mxu0 %v462_v17  ;;  %424 = vmatpush3.bf16.msra.mxu1 %v473_v23 }
  0x50   :  { %425 = vmatprep.subr.bf16.mxu1 %v580_v1 }
  0x52   :  { %189 = vmatpush1.bf16.msra.mxu0 %v464_v19 }
  0x53   :  { %190 = vmatprep.subr.bf16.mxu0 %v465_v20  ;;  %426 = vmatpush3.bf16.msra.mxu1 %v474_v25 }
  0x54   :  { %427 = vmatprep.subr.bf16.mxu1 %v580_v1 }
  0x56   :  { %191 = vmatpush1.bf16.msra.mxu0 %v467_v22 }
  0x57   :  { %428 = vmatpush3.bf16.msra.mxu1 %v475_v26 }
  0x59   :  { %209 = vmatmul.mubr.bf16.vlgmr.msra.gmra.mrb[0].mxu0 %v67_v24 }
 0x12c   :  { %v210_v32 = vpop.f32.mrb[0].mxu0 }
 0x12d   :  { %v211_v33 = vadd.f32 %v210_v32, %v89_v31  ;;  %v212_v34 = vpop.f32.mrb[1].mxu0 }
 0x12e   :  { %v214_v35 = vpop.f32.mrb[2].mxu0  ;;  %v213_v43 = vadd.f32 %v212_v34, %v93_v40 }
 0x12f   :  { %v217_v36 = vmax.f32 %v211_v33, 0.0  ;;  %v215_v37 = vpop.f32.mrb[3].mxu0 }
 0x131   :  { %v218_v38 = vpack.c.bf16 %v217_v36, %v217_v36 }
 0x133   :  { %430 = vmatmul.mubr.bf16.vlgmr.msra.gmra.mrb[0].mxu1 %v218_v38 }
 0x206   :  { %v324_v42 = vpop.f32.mrb[0].mxu1 }
 0x207   :  { %v325_v44 = vadd.f32 %v393_v41, %v324_v42  ;;  %v431_v45 = vpop.f32.mrb[1].mxu1 }
 0x208   :  { %v327_v46 = vpop.f32.mrb[2].mxu1 }
 0x209   :  { %v330_v47 = vadd.f32 %v325_v44, %v213_v43  ;;  %v432_v48 = vpop.f32.mrb[3].mxu1 }
 0x20b   :  { %331 = vadd.xlane.f32.xlu0 %v330_v47  ;;  %v333_v49 = vmul.f32 %v330_v47, %v330_v47 }
 0x20f   :  { %334 = vadd.xlane.f32.xlu0 %v333_v49 }
 0x298   :  { %v332_v50 = vpop.xlane.xlu0 %331 }
 0x299   :  { %v336_v51 = vmul.f32 0.041666668, %v332_v50 }
 0x29b   :  { %v338_v53 = vmul.f32 %v336_v51, %v336_v51  ;;  %v340_v57 = vsub.f32 %v330_v47, %v336_v51 }
 0x29c   :  { %v335_v52 = vpop.xlane.xlu0 %334 }
 0x29d   :  { %v337_v54 = vmul.f32 0.041666668, %v335_v52 }
 0x29f   :  { %v339_v55 = vsub.f32 %v337_v54, %v338_v53 }
 0x2a1   :  { %v341_v56 = vadd.f32 1e-05, %v339_v55 }
 0x2a3   :  { %476 = vrsqrt.f32 %v341_v56 }
 0x2ad   :  { %v477_v58 = vpop.eup %476 }
 0x2ae   :  { %v343_v60 = vmul.f32 %v477_v58, %v340_v57 }
 0x2b0   :  { %v351_v62 = vmul.f32 %v402_v59, %v343_v60 }
 0x2b2   :  { %v359_v63 = vadd.f32 %v403_v61, %v351_v62 }
 0x2b4   :  { %360 = vst [vmem:[#allocation8] sm:$0xff] %v359_v63 }
 0x2b5   :  { %555 = shalt.err (!%p552_p0)
}
 0x2b6   :  { %s556_s26 = scalar_lea.hbm %s690_s7, 128 }
 0x2b7   :  { %p557_p1 = scmp.ne.s32.totalorder %s690_s7, %s556_s26  ;;  %p560_p2 = scmp.lt.u32.totalorder %s556_s26, %s690_s7 }
 0x2b9   :  { %p562_p3 = pnand %p560_p2, %p557_p1 }
 0x2bb   :  { %565 = shalt.err (!%p562_p3)
}
 0x2bc   :  { %370 = dma.vmem_to_hbm [thread:$0]  %s368_s22, 128, %s690_s7, [#allocation4]  }
 0x2bd   :  { %570 = dma.done.wait [#allocation4], 128  }
 0x2be   :  { %571 = vsyncadd [#allocation4], 4294967168 }
 0x2bf   :  { %374 = vsyncpa [#allocation3], 1 }
 0x2c0   :  { %375 = vsyncpa [#allocation6], 1 }
 0x2c1   :  { %376 = vsyncpa [#allocation4], 1 }

</bundles_post_ra>
